<compile_context>
chip_gen: v6e
topology: v6e:2x2x1
jax: 0.10.0
libtpu: 0.0.40
codegen_flags: <defaults>
</compile_context>

<pallas_src>
import jax
import jax.numpy as jnp
from jax import lax
from jax.experimental import pallas as pl
from jax.experimental.pallas import tpu as pltpu


# ----------------------------------------------------------------------------
# Fused encoder (GRU) + decoder (time-MLP) kernel. Single invocation, no grid:
# total footprint is a few KB, trivially VMEM-resident on v5e/v6e/v7x.
# ----------------------------------------------------------------------------
def odevae_fused_kernel(x_ref, wih_ref, whh_ref, bih_ref, bhh_ref,
                        w1_ref, wt_ref, b1_ref, w2_ref, b2_ref, out_ref):
    S, B, I = x_ref.shape
    H = whh_ref.shape[0]
    T, _, O = out_ref.shape

    # ---- Encoder: single-layer GRU over the S input steps -------------------
    # Input-side projection for ALL steps in one MXU call (S*B rows instead of
    # S tiny calls). Both bih and the r/z portion of bhh are folded in here,
    # once, off the serial chain; the n-gate keeps b_hn inside r*(...) to
    # preserve exact PyTorch GRU semantics.
    x_all = x_ref[...].reshape(S * B, I)
    bih = bih_ref[...]                                     # (1, 3H)
    bhh = bhh_ref[...]                                     # (1, 3H)
    bhh_n = bhh[:, 2 * H:3 * H]                            # (1, H) stays in-loop
    hoist = jnp.concatenate(
        [bhh[:, 0:2 * H], jnp.zeros((1, H), jnp.float32)], axis=-1)
    gi_all = (jnp.dot(x_all, wih_ref[...], preferred_element_type=jnp.float32)
              + bih + hoist).reshape(S, B, 3 * H)

    whh = whh_ref[...]            # hoisted: loaded once, reused every step

    h = jnp.zeros((B, H), jnp.float32)
    for t in range(S):            # S is small & static -> unrolled at trace time
        gi = gi_all[t]            # (B, 3H), static index
        gh = jnp.dot(h, whh, preferred_element_type=jnp.float32)   # bias-free
        i_r, i_z, i_n = gi[:, 0:H], gi[:, H:2 * H], gi[:, 2 * H:3 * H]
        h_r, h_z = gh[:, 0:H], gh[:, H:2 * H]
        h_n = gh[:, 2 * H:3 * H] + bhh_n          # only per-step bias add left
        r = jax.nn.sigmoid(i_r + h_r)
        z = jax.nn.sigmoid(i_z + h_z)
        n = jnp.tanh(i_n + r * h_n)
        h = (1.0 - z) * n + z * h
        # NOTE: gate slices are lane-unaligned (3H=96 < 128 lanes); cheap
        # filler at H=32. If H ever scales, pad each gate to a 128-lane
        # boundary in wih/whh so the slices become whole-vreg moves.

    # ---- Decoder: time-conditioned MLP for all T target rows at once --------
    base = (jnp.dot(h, w1_ref[...], preferred_element_type=jnp.float32)
            + b1_ref[...])                                        # (B, H)
    base_all = jnp.broadcast_to(base[None], (T, B, H))            # (T, B, H)
    # 1-based torch timetable row index, regenerated in-kernel from a tiny
    # 2-D sublane iota (no integer divide, no (T*B,H)-sized int relayout).
    tvals = (lax.broadcasted_iota(jnp.int32, (T, B), 0) + 1).astype(jnp.float32)
    hid = jnp.tanh(base_all + tvals[:, :, None] * wt_ref[...])    # (T, B, H)
    hid2 = hid.reshape(T * B, H)                                  # leading-dim merge
    out = (jnp.dot(hid2, w2_ref[...], preferred_element_type=jnp.float32)
           + b2_ref[...])                                         # (T*B, O)
    out_ref[...] = out.reshape(T, B, O)


# ----------------------------------------------------------------------------
# ODEVAE.forward glue
# ----------------------------------------------------------------------------
def odevae_forward(params, input_tensor, target_tensor):
    S, B, I = input_tensor.shape
    H = params["whh"].shape[0]
    O = params["w2"].shape[1]
    T = target_tensor.shape[0]
    # torch builds time[i-1, j, 0] = i from target_tensor's first two dims;
    # the kernel regenerates the per-row value i in-VMEM, so the timetable
    # tensor itself never needs to be materialized or prefetched.
    # TODO(synk): the original encoder/decoder are injected nn.Modules; the
    # concrete GRU-encoder + time-MLP-decoder pair here broadcasts the time
    # index over the decode batch B, which matches ref_forward but differs
    # from torch's (T, D, 1) time tensor layout whenever D != B.
    vmem = pl.BlockSpec(memory_space=pltpu.MemorySpace.VMEM)
    return pl.pallas_call(
        odevae_fused_kernel,
        out_shape=jax.ShapeDtypeStruct((T, B, O), jnp.float32),
        in_specs=[vmem] * 10,
        out_specs=vmem,
    )(input_tensor,
      params["wih"], params["whh"], params["bih"], params["bhh"],
      params["w1"], params["wt"], params["b1"], params["w2"], params["b2"])


# ----------------------------------------------------------------------------
# Pure-JAX reference (for correctness check) — exact PyTorch-GRU semantics.
# ----------------------------------------------------------------------------
def ref_forward(params, x, target):
    S, B, I = x.shape
    H = params["whh"].shape[0]
    h = jnp.zeros((B, H), jnp.float32)
    for t in range(S):
        gi = x[t] @ params["wih"] + params["bih"]
        gh = h @ params["whh"] + params["bhh"]
        i_r, i_z, i_n = jnp.split(gi, 3, axis=-1)
        h_r, h_z, h_n = jnp.split(gh, 3, axis=-1)
        r = jax.nn.sigmoid(i_r + h_r)
        z = jax.nn.sigmoid(i_z + h_z)
        n = jnp.tanh(i_n + r * h_n)
        h = (1.0 - z) * n + z * h
    T = target.shape[0]
    outs = []
    for t in range(T):
        tv = jnp.float32(t + 1)
        hid = jnp.tanh(h @ params["w1"] + tv * params["wt"] + params["b1"])
        outs.append(hid @ params["w2"] + params["b2"])
    return jnp.stack(outs)


def init_params(key, input_dim, hidden_dim, output_dim):
    ks = jax.random.split(key, 9)
    s_i = 1.0 / jnp.sqrt(jnp.float32(input_dim))
    s_h = 1.0 / jnp.sqrt(jnp.float32(hidden_dim))
    return {
        "wih": jax.random.uniform(ks[0], (input_dim, 3 * hidden_dim), jnp.float32, -s_i, s_i),
        "whh": jax.random.uniform(ks[1], (hidden_dim, 3 * hidden_dim), jnp.float32, -s_h, s_h),
        "bih": jax.random.uniform(ks[2], (1, 3 * hidden_dim), jnp.float32, -s_h, s_h),
        "bhh": jax.random.uniform(ks[3], (1, 3 * hidden_dim), jnp.float32, -s_h, s_h),
        "w1":  jax.random.uniform(ks[4], (hidden_dim, hidden_dim), jnp.float32, -s_h, s_h),
        "wt":  jax.random.uniform(ks[5], (1, hidden_dim), jnp.float32, -s_h, s_h),
        "b1":  jax.random.uniform(ks[6], (1, hidden_dim), jnp.float32, -s_h, s_h),
        "w2":  jax.random.uniform(ks[7], (hidden_dim, output_dim), jnp.float32, -s_h, s_h),
        "b2":  jax.random.uniform(ks[8], (1, output_dim), jnp.float32, -s_h, s_h),
    }


if __name__ == "__main__":
    # Small, module-consistent shapes.
    S, B, I = 8, 8, 16          # input sequence: (seq, batch, input_dim)
    H = 32                      # latent / hidden_dim
    O = 16                      # target_size / output_dim
    T, D = 6, 4                 # target_tensor first two dims (drives `time`)

    key = jax.random.PRNGKey(0)
    k_x, k_t, k_p = jax.random.split(key, 3)
    input_tensor = jax.random.normal(k_x, (S, B, I), jnp.float32)
    target_tensor = jax.random.normal(k_t, (T, D), jnp.float32)
    params = init_params(k_p, I, H, O)

    out = odevae_forward(params, input_tensor, target_tensor)
    out = jax.block_until_ready(out)

    ref = ref_forward(params, input_tensor, target_tensor)
    assert out.shape == (T, B, O), out.shape
    assert jnp.allclose(out, ref, rtol=1e-3, atol=1e-3), "mismatch vs reference"

    # TODO(synk): encoder/decoder are injected nn.Modules in the original code;
    # a concrete GRU-encoder + time-MLP-decoder pair was instantiated here.
    # Training / generate_with_seed / DTW-loss paths are out of forward scope.
    print("KERNEL_OK")
</pallas_src>

<mosaic_0001>
module attributes {stable_mosaic.version = 11 : i64} {
  func.func @odevae_fused_kernel(%arg0: memref<8x8x16xf32, #tpu.memory_space<vmem>>, %arg1: memref<16x96xf32, #tpu.memory_space<vmem>>, %arg2: memref<32x96xf32, #tpu.memory_space<vmem>>, %arg3: memref<1x96xf32, #tpu.memory_space<vmem>>, %arg4: memref<1x96xf32, #tpu.memory_space<vmem>>, %arg5: memref<32x32xf32, #tpu.memory_space<vmem>>, %arg6: memref<1x32xf32, #tpu.memory_space<vmem>>, %arg7: memref<1x32xf32, #tpu.memory_space<vmem>>, %arg8: memref<32x16xf32, #tpu.memory_space<vmem>>, %arg9: memref<1x16xf32, #tpu.memory_space<vmem>>, %arg10: memref<6x8x16xf32, #tpu.memory_space<vmem>>) attributes {dimension_semantics = [], scalar_prefetch = 0 : i64, scratch_operands = 0 : i64, tpu.core_type = #tpu.core_type<tc>} {
    %c0 = arith.constant 0 : index
    %c0_0 = arith.constant 0 : index
    %c0_1 = arith.constant 0 : index
    %0 = vector.load %arg0[%c0, %c0_0, %c0_1] : memref<8x8x16xf32, #tpu.memory_space<vmem>>, vector<8x8x16xf32>
    %1 = vector.shape_cast %0 : vector<8x8x16xf32> to vector<64x16xf32>
    %c0_2 = arith.constant 0 : index
    %c0_3 = arith.constant 0 : index
    %2 = vector.load %arg3[%c0_2, %c0_3] : memref<1x96xf32, #tpu.memory_space<vmem>>, vector<1x96xf32>
    %c0_4 = arith.constant 0 : index
    %c0_5 = arith.constant 0 : index
    %3 = vector.load %arg4[%c0_4, %c0_5] : memref<1x96xf32, #tpu.memory_space<vmem>>, vector<1x96xf32>
    %4 = vector.extract_strided_slice %3 {offsets = [0, 64], sizes = [1, 32], strides = [1, 1]} : vector<1x96xf32> to vector<1x32xf32>
    %5 = vector.extract_strided_slice %3 {offsets = [0, 0], sizes = [1, 64], strides = [1, 1]} : vector<1x96xf32> to vector<1x64xf32>
    %cst = arith.constant 0.000000e+00 : f32
    %6 = vector.broadcast %cst : f32 to vector<1x32xf32>
    %7 = tpu.concatenate %5, %6 in 1 : vector<1x64xf32>, vector<1x32xf32> -> vector<1x96xf32>
    %c0_6 = arith.constant 0 : index
    %c0_7 = arith.constant 0 : index
    %8 = vector.load %arg1[%c0_6, %c0_7] : memref<16x96xf32, #tpu.memory_space<vmem>>, vector<16x96xf32>
    %cst_8 = arith.constant dense<0.000000e+00> : vector<64x96xf32>
    %9 = tpu.matmul %1, %8, %cst_8 {dimension_numbers = #tpu.dot_dimension_numbers<[1], [0], [0], [1], [0, 0, 1, 1], [], []>} : vector<64x16xf32>, vector<16x96xf32>, vector<64x96xf32> -> vector<64x96xf32>
    %10 = vector.broadcast %2 : vector<1x96xf32> to vector<64x96xf32>
    %11 = arith.addf %9, %10 : vector<64x96xf32>
    %12 = vector.broadcast %7 : vector<1x96xf32> to vector<64x96xf32>
    %13 = arith.addf %11, %12 : vector<64x96xf32>
    %14 = vector.shape_cast %13 : vector<64x96xf32> to vector<8x8x96xf32>
    %c0_9 = arith.constant 0 : index
    %c0_10 = arith.constant 0 : index
    %15 = vector.load %arg2[%c0_9, %c0_10] : memref<32x96xf32, #tpu.memory_space<vmem>>, vector<32x96xf32>
    %cst_11 = arith.constant 0.000000e+00 : f32
    %16 = vector.broadcast %cst_11 : f32 to vector<8x32xf32>
    %17 = vector.extract_strided_slice %14 {offsets = [0, 0, 0], sizes = [1, 8, 96], strides = [1, 1, 1]} : vector<8x8x96xf32> to vector<1x8x96xf32>
    %18 = vector.shape_cast %17 : vector<1x8x96xf32> to vector<8x96xf32>
    %cst_12 = arith.constant dense<0.000000e+00> : vector<8x96xf32>
    %19 = tpu.matmul %16, %15, %cst_12 {dimension_numbers = #tpu.dot_dimension_numbers<[1], [0], [0], [1], [0, 0, 1, 1], [], []>} : vector<8x32xf32>, vector<32x96xf32>, vector<8x96xf32> -> vector<8x96xf32>
    %20 = vector.extract_strided_slice %18 {offsets = [0, 0], sizes = [8, 32], strides = [1, 1]} : vector<8x96xf32> to vector<8x32xf32>
    %21 = vector.extract_strided_slice %18 {offsets = [0, 32], sizes = [8, 32], strides = [1, 1]} : vector<8x96xf32> to vector<8x32xf32>
    %22 = vector.extract_strided_slice %18 {offsets = [0, 64], sizes = [8, 32], strides = [1, 1]} : vector<8x96xf32> to vector<8x32xf32>
    %23 = vector.extract_strided_slice %19 {offsets = [0, 0], sizes = [8, 32], strides = [1, 1]} : vector<8x96xf32> to vector<8x32xf32>
    %24 = vector.extract_strided_slice %19 {offsets = [0, 32], sizes = [8, 32], strides = [1, 1]} : vector<8x96xf32> to vector<8x32xf32>
    %25 = vector.extract_strided_slice %19 {offsets = [0, 64], sizes = [8, 32], strides = [1, 1]} : vector<8x96xf32> to vector<8x32xf32>
    %26 = vector.broadcast %4 : vector<1x32xf32> to vector<8x32xf32>
    %27 = arith.addf %25, %26 : vector<8x32xf32>
    %28 = arith.addf %20, %23 : vector<8x32xf32>
    %29 = arith.negf %28 : vector<8x32xf32>
    %30 = math.exp %29 : vector<8x32xf32>
    %cst_13 = arith.constant 1.000000e+00 : f32
    %31 = vector.broadcast %cst_13 : f32 to vector<8x32xf32>
    %32 = arith.addf %31, %30 : vector<8x32xf32>
    %33 = arith.divf %31, %32 : vector<8x32xf32>
    %34 = arith.addf %21, %24 : vector<8x32xf32>
    %35 = arith.negf %34 : vector<8x32xf32>
    %36 = math.exp %35 : vector<8x32xf32>
    %cst_14 = arith.constant 1.000000e+00 : f32
    %37 = vector.broadcast %cst_14 : f32 to vector<8x32xf32>
    %38 = arith.addf %37, %36 : vector<8x32xf32>
    %39 = arith.divf %37, %38 : vector<8x32xf32>
    %40 = arith.mulf %33, %27 : vector<8x32xf32>
    %41 = arith.addf %22, %40 : vector<8x32xf32>
    %42 = math.tanh %41 : vector<8x32xf32>
    %cst_15 = arith.constant 1.000000e+00 : f32
    %43 = vector.broadcast %cst_15 : f32 to vector<8x32xf32>
    %44 = arith.subf %43, %39 : vector<8x32xf32>
    %45 = arith.mulf %44, %42 : vector<8x32xf32>
    %46 = arith.mulf %39, %16 : vector<8x32xf32>
    %47 = arith.addf %45, %46 : vector<8x32xf32>
    %48 = vector.extract_strided_slice %14 {offsets = [1, 0, 0], sizes = [1, 8, 96], strides = [1, 1, 1]} : vector<8x8x96xf32> to vector<1x8x96xf32>
    %49 = vector.shape_cast %48 : vector<1x8x96xf32> to vector<8x96xf32>
    %cst_16 = arith.constant dense<0.000000e+00> : vector<8x96xf32>
    %50 = tpu.matmul %47, %15, %cst_16 {dimension_numbers = #tpu.dot_dimension_numbers<[1], [0], [0], [1], [0, 0, 1, 1], [], []>} : vector<8x32xf32>, vector<32x96xf32>, vector<8x96xf32> -> vector<8x96xf32>
    %51 = vector.extract_strided_slice %49 {offsets = [0, 0], sizes = [8, 32], strides = [1, 1]} : vector<8x96xf32> to vector<8x32xf32>
    %52 = vector.extract_strided_slice %49 {offsets = [0, 32], sizes = [8, 32], strides = [1, 1]} : vector<8x96xf32> to vector<8x32xf32>
    %53 = vector.extract_strided_slice %49 {offsets = [0, 64], sizes = [8, 32], strides = [1, 1]} : vector<8x96xf32> to vector<8x32xf32>
    %54 = vector.extract_strided_slice %50 {offsets = [0, 0], sizes = [8, 32], strides = [1, 1]} : vector<8x96xf32> to vector<8x32xf32>
    %55 = vector.extract_strided_slice %50 {offsets = [0, 32], sizes = [8, 32], strides = [1, 1]} : vector<8x96xf32> to vector<8x32xf32>
    %56 = vector.extract_strided_slice %50 {offsets = [0, 64], sizes = [8, 32], strides = [1, 1]} : vector<8x96xf32> to vector<8x32xf32>
    %57 = vector.broadcast %4 : vector<1x32xf32> to vector<8x32xf32>
    %58 = arith.addf %56, %57 : vector<8x32xf32>
    %59 = arith.addf %51, %54 : vector<8x32xf32>
    %60 = arith.negf %59 : vector<8x32xf32>
    %61 = math.exp %60 : vector<8x32xf32>
    %cst_17 = arith.constant 1.000000e+00 : f32
    %62 = vector.broadcast %cst_17 : f32 to vector<8x32xf32>
    %63 = arith.addf %62, %61 : vector<8x32xf32>
    %64 = arith.divf %62, %63 : vector<8x32xf32>
    %65 = arith.addf %52, %55 : vector<8x32xf32>
    %66 = arith.negf %65 : vector<8x32xf32>
    %67 = math.exp %66 : vector<8x32xf32>
    %cst_18 = arith.constant 1.000000e+00 : f32
    %68 = vector.broadcast %cst_18 : f32 to vector<8x32xf32>
    %69 = arith.addf %68, %67 : vector<8x32xf32>
    %70 = arith.divf %68, %69 : vector<8x32xf32>
    %71 = arith.mulf %64, %58 : vector<8x32xf32>
    %72 = arith.addf %53, %71 : vector<8x32xf32>
    %73 = math.tanh %72 : vector<8x32xf32>
    %cst_19 = arith.constant 1.000000e+00 : f32
    %74 = vector.broadcast %cst_19 : f32 to vector<8x32xf32>
    %75 = arith.subf %74, %70 : vector<8x32xf32>
    %76 = arith.mulf %75, %73 : vector<8x32xf32>
    %77 = arith.mulf %70, %47 : vector<8x32xf32>
    %78 = arith.addf %76, %77 : vector<8x32xf32>
    %79 = vector.extract_strided_slice %14 {offsets = [2, 0, 0], sizes = [1, 8, 96], strides = [1, 1, 1]} : vector<8x8x96xf32> to vector<1x8x96xf32>
    %80 = vector.shape_cast %79 : vector<1x8x96xf32> to vector<8x96xf32>
    %cst_20 = arith.constant dense<0.000000e+00> : vector<8x96xf32>
    %81 = tpu.matmul %78, %15, %cst_20 {dimension_numbers = #tpu.dot_dimension_numbers<[1], [0], [0], [1], [0, 0, 1, 1], [], []>} : vector<8x32xf32>, vector<32x96xf32>, vector<8x96xf32> -> vector<8x96xf32>
    %82 = vector.extract_strided_slice %80 {offsets = [0, 0], sizes = [8, 32], strides = [1, 1]} : vector<8x96xf32> to vector<8x32xf32>
    %83 = vector.extract_strided_slice %80 {offsets = [0, 32], sizes = [8, 32], strides = [1, 1]} : vector<8x96xf32> to vector<8x32xf32>
    %84 = vector.extract_strided_slice %80 {offsets = [0, 64], sizes = [8, 32], strides = [1, 1]} : vector<8x96xf32> to vector<8x32xf32>
    %85 = vector.extract_strided_slice %81 {offsets = [0, 0], sizes = [8, 32], strides = [1, 1]} : vector<8x96xf32> to vector<8x32xf32>
    %86 = vector.extract_strided_slice %81 {offsets = [0, 32], sizes = [8, 32], strides = [1, 1]} : vector<8x96xf32> to vector<8x32xf32>
    %87 = vector.extract_strided_slice %81 {offsets = [0, 64], sizes = [8, 32], strides = [1, 1]} : vector<8x96xf32> to vector<8x32xf32>
    %88 = vector.broadcast %4 : vector<1x32xf32> to vector<8x32xf32>
    %89 = arith.addf %87, %88 : vector<8x32xf32>
    %90 = arith.addf %82, %85 : vector<8x32xf32>
    %91 = arith.negf %90 : vector<8x32xf32>
    %92 = math.exp %91 : vector<8x32xf32>
    %cst_21 = arith.constant 1.000000e+00 : f32
    %93 = vector.broadcast %cst_21 : f32 to vector<8x32xf32>
    %94 = arith.addf %93, %92 : vector<8x32xf32>
    %95 = arith.divf %93, %94 : vector<8x32xf32>
    %96 = arith.addf %83, %86 : vector<8x32xf32>
    %97 = arith.negf %96 : vector<8x32xf32>
    %98 = math.exp %97 : vector<8x32xf32>
    %cst_22 = arith.constant 1.000000e+00 : f32
    %99 = vector.broadcast %cst_22 : f32 to vector<8x32xf32>
    %100 = arith.addf %99, %98 : vector<8x32xf32>
    %101 = arith.divf %99, %100 : vector<8x32xf32>
    %102 = arith.mulf %95, %89 : vector<8x32xf32>
    %103 = arith.addf %84, %102 : vector<8x32xf32>
    %104 = math.tanh %103 : vector<8x32xf32>
    %cst_23 = arith.constant 1.000000e+00 : f32
    %105 = vector.broadcast %cst_23 : f32 to vector<8x32xf32>
    %106 = arith.subf %105, %101 : vector<8x32xf32>
    %107 = arith.mulf %106, %104 : vector<8x32xf32>
    %108 = arith.mulf %101, %78 : vector<8x32xf32>
    %109 = arith.addf %107, %108 : vector<8x32xf32>
    %110 = vector.extract_strided_slice %14 {offsets = [3, 0, 0], sizes = [1, 8, 96], strides = [1, 1, 1]} : vector<8x8x96xf32> to vector<1x8x96xf32>
    %111 = vector.shape_cast %110 : vector<1x8x96xf32> to vector<8x96xf32>
    %cst_24 = arith.constant dense<0.000000e+00> : vector<8x96xf32>
    %112 = tpu.matmul %109, %15, %cst_24 {dimension_numbers = #tpu.dot_dimension_numbers<[1], [0], [0], [1], [0, 0, 1, 1], [], []>} : vector<8x32xf32>, vector<32x96xf32>, vector<8x96xf32> -> vector<8x96xf32>
    %113 = vector.extract_strided_slice %111 {offsets = [0, 0], sizes = [8, 32], strides = [1, 1]} : vector<8x96xf32> to vector<8x32xf32>
    %114 = vector.extract_strided_slice %111 {offsets = [0, 32], sizes = [8, 32], strides = [1, 1]} : vector<8x96xf32> to vector<8x32xf32>
    %115 = vector.extract_strided_slice %111 {offsets = [0, 64], sizes = [8, 32], strides = [1, 1]} : vector<8x96xf32> to vector<8x32xf32>
    %116 = vector.extract_strided_slice %112 {offsets = [0, 0], sizes = [8, 32], strides = [1, 1]} : vector<8x96xf32> to vector<8x32xf32>
    %117 = vector.extract_strided_slice %112 {offsets = [0, 32], sizes = [8, 32], strides = [1, 1]} : vector<8x96xf32> to vector<8x32xf32>
    %118 = vector.extract_strided_slice %112 {offsets = [0, 64], sizes = [8, 32], strides = [1, 1]} : vector<8x96xf32> to vector<8x32xf32>
    %119 = vector.broadcast %4 : vector<1x32xf32> to vector<8x32xf32>
    %120 = arith.addf %118, %119 : vector<8x32xf32>
    %121 = arith.addf %113, %116 : vector<8x32xf32>
    %122 = arith.negf %121 : vector<8x32xf32>
    %123 = math.exp %122 : vector<8x32xf32>
    %cst_25 = arith.constant 1.000000e+00 : f32
    %124 = vector.broadcast %cst_25 : f32 to vector<8x32xf32>
    %125 = arith.addf %124, %123 : vector<8x32xf32>
    %126 = arith.divf %124, %125 : vector<8x32xf32>
    %127 = arith.addf %114, %117 : vector<8x32xf32>
    %128 = arith.negf %127 : vector<8x32xf32>
    %129 = math.exp %128 : vector<8x32xf32>
    %cst_26 = arith.constant 1.000000e+00 : f32
    %130 = vector.broadcast %cst_26 : f32 to vector<8x32xf32>
    %131 = arith.addf %130, %129 : vector<8x32xf32>
    %132 = arith.divf %130, %131 : vector<8x32xf32>
    %133 = arith.mulf %126, %120 : vector<8x32xf32>
    %134 = arith.addf %115, %133 : vector<8x32xf32>
    %135 = math.tanh %134 : vector<8x32xf32>
    %cst_27 = arith.constant 1.000000e+00 : f32
    %136 = vector.broadcast %cst_27 : f32 to vector<8x32xf32>
    %137 = arith.subf %136, %132 : vector<8x32xf32>
    %138 = arith.mulf %137, %135 : vector<8x32xf32>
    %139 = arith.mulf %132, %109 : vector<8x32xf32>
    %140 = arith.addf %138, %139 : vector<8x32xf32>
    %141 = vector.extract_strided_slice %14 {offsets = [4, 0, 0], sizes = [1, 8, 96], strides = [1, 1, 1]} : vector<8x8x96xf32> to vector<1x8x96xf32>
    %142 = vector.shape_cast %141 : vector<1x8x96xf32> to vector<8x96xf32>
    %cst_28 = arith.constant dense<0.000000e+00> : vector<8x96xf32>
    %143 = tpu.matmul %140, %15, %cst_28 {dimension_numbers = #tpu.dot_dimension_numbers<[1], [0], [0], [1], [0, 0, 1, 1], [], []>} : vector<8x32xf32>, vector<32x96xf32>, vector<8x96xf32> -> vector<8x96xf32>
    %144 = vector.extract_strided_slice %142 {offsets = [0, 0], sizes = [8, 32], strides = [1, 1]} : vector<8x96xf32> to vector<8x32xf32>
    %145 = vector.extract_strided_slice %142 {offsets = [0, 32], sizes = [8, 32], strides = [1, 1]} : vector<8x96xf32> to vector<8x32xf32>
    %146 = vector.extract_strided_slice %142 {offsets = [0, 64], sizes = [8, 32], strides = [1, 1]} : vector<8x96xf32> to vector<8x32xf32>
    %147 = vector.extract_strided_slice %143 {offsets = [0, 0], sizes = [8, 32], strides = [1, 1]} : vector<8x96xf32> to vector<8x32xf32>
    %148 = vector.extract_strided_slice %143 {offsets = [0, 32], sizes = [8, 32], strides = [1, 1]} : vector<8x96xf32> to vector<8x32xf32>
    %149 = vector.extract_strided_slice %143 {offsets = [0, 64], sizes = [8, 32], strides = [1, 1]} : vector<8x96xf32> to vector<8x32xf32>
    %150 = vector.broadcast %4 : vector<1x32xf32> to vector<8x32xf32>
    %151 = arith.addf %149, %150 : vector<8x32xf32>
    %152 = arith.addf %144, %147 : vector<8x32xf32>
    %153 = arith.negf %152 : vector<8x32xf32>
    %154 = math.exp %153 : vector<8x32xf32>
    %cst_29 = arith.constant 1.000000e+00 : f32
    %155 = vector.broadcast %cst_29 : f32 to vector<8x32xf32>
    %156 = arith.addf %155, %154 : vector<8x32xf32>
    %157 = arith.divf %155, %156 : vector<8x32xf32>
    %158 = arith.addf %145, %148 : vector<8x32xf32>
    %159 = arith.negf %158 : vector<8x32xf32>
    %160 = math.exp %159 : vector<8x32xf32>
    %cst_30 = arith.constant 1.000000e+00 : f32
    %161 = vector.broadcast %cst_30 : f32 to vector<8x32xf32>
    %162 = arith.addf %161, %160 : vector<8x32xf32>
    %163 = arith.divf %161, %162 : vector<8x32xf32>
    %164 = arith.mulf %157, %151 : vector<8x32xf32>
    %165 = arith.addf %146, %164 : vector<8x32xf32>
    %166 = math.tanh %165 : vector<8x32xf32>
    %cst_31 = arith.constant 1.000000e+00 : f32
    %167 = vector.broadcast %cst_31 : f32 to vector<8x32xf32>
    %168 = arith.subf %167, %163 : vector<8x32xf32>
    %169 = arith.mulf %168, %166 : vector<8x32xf32>
    %170 = arith.mulf %163, %140 : vector<8x32xf32>
    %171 = arith.addf %169, %170 : vector<8x32xf32>
    %172 = vector.extract_strided_slice %14 {offsets = [5, 0, 0], sizes = [1, 8, 96], strides = [1, 1, 1]} : vector<8x8x96xf32> to vector<1x8x96xf32>
    %173 = vector.shape_cast %172 : vector<1x8x96xf32> to vector<8x96xf32>
    %cst_32 = arith.constant dense<0.000000e+00> : vector<8x96xf32>
    %174 = tpu.matmul %171, %15, %cst_32 {dimension_numbers = #tpu.dot_dimension_numbers<[1], [0], [0], [1], [0, 0, 1, 1], [], []>} : vector<8x32xf32>, vector<32x96xf32>, vector<8x96xf32> -> vector<8x96xf32>
    %175 = vector.extract_strided_slice %173 {offsets = [0, 0], sizes = [8, 32], strides = [1, 1]} : vector<8x96xf32> to vector<8x32xf32>
    %176 = vector.extract_strided_slice %173 {offsets = [0, 32], sizes = [8, 32], strides = [1, 1]} : vector<8x96xf32> to vector<8x32xf32>
    %177 = vector.extract_strided_slice %173 {offsets = [0, 64], sizes = [8, 32], strides = [1, 1]} : vector<8x96xf32> to vector<8x32xf32>
    %178 = vector.extract_strided_slice %174 {offsets = [0, 0], sizes = [8, 32], strides = [1, 1]} : vector<8x96xf32> to vector<8x32xf32>
    %179 = vector.extract_strided_slice %174 {offsets = [0, 32], sizes = [8, 32], strides = [1, 1]} : vector<8x96xf32> to vector<8x32xf32>
    %180 = vector.extract_strided_slice %174 {offsets = [0, 64], sizes = [8, 32], strides = [1, 1]} : vector<8x96xf32> to vector<8x32xf32>
    %181 = vector.broadcast %4 : vector<1x32xf32> to vector<8x32xf32>
    %182 = arith.addf %180, %181 : vector<8x32xf32>
    %183 = arith.addf %175, %178 : vector<8x32xf32>
    %184 = arith.negf %183 : vector<8x32xf32>
    %185 = math.exp %184 : vector<8x32xf32>
    %cst_33 = arith.constant 1.000000e+00 : f32
    %186 = vector.broadcast %cst_33 : f32 to vector<8x32xf32>
    %187 = arith.addf %186, %185 : vector<8x32xf32>
    %188 = arith.divf %186, %187 : vector<8x32xf32>
    %189 = arith.addf %176, %179 : vector<8x32xf32>
    %190 = arith.negf %189 : vector<8x32xf32>
    %191 = math.exp %190 : vector<8x32xf32>
    %cst_34 = arith.constant 1.000000e+00 : f32
    %192 = vector.broadcast %cst_34 : f32 to vector<8x32xf32>
    %193 = arith.addf %192, %191 : vector<8x32xf32>
    %194 = arith.divf %192, %193 : vector<8x32xf32>
    %195 = arith.mulf %188, %182 : vector<8x32xf32>
    %196 = arith.addf %177, %195 : vector<8x32xf32>
    %197 = math.tanh %196 : vector<8x32xf32>
    %cst_35 = arith.constant 1.000000e+00 : f32
    %198 = vector.broadcast %cst_35 : f32 to vector<8x32xf32>
    %199 = arith.subf %198, %194 : vector<8x32xf32>
    %200 = arith.mulf %199, %197 : vector<8x32xf32>
    %201 = arith.mulf %194, %171 : vector<8x32xf32>
    %202 = arith.addf %200, %201 : vector<8x32xf32>
    %203 = vector.extract_strided_slice %14 {offsets = [6, 0, 0], sizes = [1, 8, 96], strides = [1, 1, 1]} : vector<8x8x96xf32> to vector<1x8x96xf32>
    %204 = vector.shape_cast %203 : vector<1x8x96xf32> to vector<8x96xf32>
    %cst_36 = arith.constant dense<0.000000e+00> : vector<8x96xf32>
    %205 = tpu.matmul %202, %15, %cst_36 {dimension_numbers = #tpu.dot_dimension_numbers<[1], [0], [0], [1], [0, 0, 1, 1], [], []>} : vector<8x32xf32>, vector<32x96xf32>, vector<8x96xf32> -> vector<8x96xf32>
    %206 = vector.extract_strided_slice %204 {offsets = [0, 0], sizes = [8, 32], strides = [1, 1]} : vector<8x96xf32> to vector<8x32xf32>
    %207 = vector.extract_strided_slice %204 {offsets = [0, 32], sizes = [8, 32], strides = [1, 1]} : vector<8x96xf32> to vector<8x32xf32>
    %208 = vector.extract_strided_slice %204 {offsets = [0, 64], sizes = [8, 32], strides = [1, 1]} : vector<8x96xf32> to vector<8x32xf32>
    %209 = vector.extract_strided_slice %205 {offsets = [0, 0], sizes = [8, 32], strides = [1, 1]} : vector<8x96xf32> to vector<8x32xf32>
    %210 = vector.extract_strided_slice %205 {offsets = [0, 32], sizes = [8, 32], strides = [1, 1]} : vector<8x96xf32> to vector<8x32xf32>
    %211 = vector.extract_strided_slice %205 {offsets = [0, 64], sizes = [8, 32], strides = [1, 1]} : vector<8x96xf32> to vector<8x32xf32>
    %212 = vector.broadcast %4 : vector<1x32xf32> to vector<8x32xf32>
    %213 = arith.addf %211, %212 : vector<8x32xf32>
    %214 = arith.addf %206, %209 : vector<8x32xf32>
    %215 = arith.negf %214 : vector<8x32xf32>
    %216 = math.exp %215 : vector<8x32xf32>
    %cst_37 = arith.constant 1.000000e+00 : f32
    %217 = vector.broadcast %cst_37 : f32 to vector<8x32xf32>
    %218 = arith.addf %217, %216 : vector<8x32xf32>
    %219 = arith.divf %217, %218 : vector<8x32xf32>
    %220 = arith.addf %207, %210 : vector<8x32xf32>
    %221 = arith.negf %220 : vector<8x32xf32>
    %222 = math.exp %221 : vector<8x32xf32>
    %cst_38 = arith.constant 1.000000e+00 : f32
    %223 = vector.broadcast %cst_38 : f32 to vector<8x32xf32>
    %224 = arith.addf %223, %222 : vector<8x32xf32>
    %225 = arith.divf %223, %224 : vector<8x32xf32>
    %226 = arith.mulf %219, %213 : vector<8x32xf32>
    %227 = arith.addf %208, %226 : vector<8x32xf32>
    %228 = math.tanh %227 : vector<8x32xf32>
    %cst_39 = arith.constant 1.000000e+00 : f32
    %229 = vector.broadcast %cst_39 : f32 to vector<8x32xf32>
    %230 = arith.subf %229, %225 : vector<8x32xf32>
    %231 = arith.mulf %230, %228 : vector<8x32xf32>
    %232 = arith.mulf %225, %202 : vector<8x32xf32>
    %233 = arith.addf %231, %232 : vector<8x32xf32>
    %234 = vector.extract_strided_slice %14 {offsets = [7, 0, 0], sizes = [1, 8, 96], strides = [1, 1, 1]} : vector<8x8x96xf32> to vector<1x8x96xf32>
    %235 = vector.shape_cast %234 : vector<1x8x96xf32> to vector<8x96xf32>
    %cst_40 = arith.constant dense<0.000000e+00> : vector<8x96xf32>
    %236 = tpu.matmul %233, %15, %cst_40 {dimension_numbers = #tpu.dot_dimension_numbers<[1], [0], [0], [1], [0, 0, 1, 1], [], []>} : vector<8x32xf32>, vector<32x96xf32>, vector<8x96xf32> -> vector<8x96xf32>
    %237 = vector.extract_strided_slice %235 {offsets = [0, 0], sizes = [8, 32], strides = [1, 1]} : vector<8x96xf32> to vector<8x32xf32>
    %238 = vector.extract_strided_slice %235 {offsets = [0, 32], sizes = [8, 32], strides = [1, 1]} : vector<8x96xf32> to vector<8x32xf32>
    %239 = vector.extract_strided_slice %235 {offsets = [0, 64], sizes = [8, 32], strides = [1, 1]} : vector<8x96xf32> to vector<8x32xf32>
    %240 = vector.extract_strided_slice %236 {offsets = [0, 0], sizes = [8, 32], strides = [1, 1]} : vector<8x96xf32> to vector<8x32xf32>
    %241 = vector.extract_strided_slice %236 {offsets = [0, 32], sizes = [8, 32], strides = [1, 1]} : vector<8x96xf32> to vector<8x32xf32>
    %242 = vector.extract_strided_slice %236 {offsets = [0, 64], sizes = [8, 32], strides = [1, 1]} : vector<8x96xf32> to vector<8x32xf32>
    %243 = vector.broadcast %4 : vector<1x32xf32> to vector<8x32xf32>
    %244 = arith.addf %242, %243 : vector<8x32xf32>
    %245 = arith.addf %237, %240 : vector<8x32xf32>
    %246 = arith.negf %245 : vector<8x32xf32>
    %247 = math.exp %246 : vector<8x32xf32>
    %cst_41 = arith.constant 1.000000e+00 : f32
    %248 = vector.broadcast %cst_41 : f32 to vector<8x32xf32>
    %249 = arith.addf %248, %247 : vector<8x32xf32>
    %250 = arith.divf %248, %249 : vector<8x32xf32>
    %251 = arith.addf %238, %241 : vector<8x32xf32>
    %252 = arith.negf %251 : vector<8x32xf32>
    %253 = math.exp %252 : vector<8x32xf32>
    %cst_42 = arith.constant 1.000000e+00 : f32
    %254 = vector.broadcast %cst_42 : f32 to vector<8x32xf32>
    %255 = arith.addf %254, %253 : vector<8x32xf32>
    %256 = arith.divf %254, %255 : vector<8x32xf32>
    %257 = arith.mulf %250, %244 : vector<8x32xf32>
    %258 = arith.addf %239, %257 : vector<8x32xf32>
    %259 = math.tanh %258 : vector<8x32xf32>
    %cst_43 = arith.constant 1.000000e+00 : f32
    %260 = vector.broadcast %cst_43 : f32 to vector<8x32xf32>
    %261 = arith.subf %260, %256 : vector<8x32xf32>
    %262 = arith.mulf %261, %259 : vector<8x32xf32>
    %263 = arith.mulf %256, %233 : vector<8x32xf32>
    %264 = arith.addf %262, %263 : vector<8x32xf32>
    %c0_44 = arith.constant 0 : index
    %c0_45 = arith.constant 0 : index
    %265 = vector.load %arg5[%c0_44, %c0_45] : memref<32x32xf32, #tpu.memory_space<vmem>>, vector<32x32xf32>
    %cst_46 = arith.constant dense<0.000000e+00> : vector<8x32xf32>
    %266 = tpu.matmul %264, %265, %cst_46 {dimension_numbers = #tpu.dot_dimension_numbers<[1], [0], [0], [1], [0, 0, 1, 1], [], []>} : vector<8x32xf32>, vector<32x32xf32>, vector<8x32xf32> -> vector<8x32xf32>
    %c0_47 = arith.constant 0 : index
    %c0_48 = arith.constant 0 : index
    %267 = vector.load %arg7[%c0_47, %c0_48] : memref<1x32xf32, #tpu.memory_space<vmem>>, vector<1x32xf32>
    %268 = vector.broadcast %267 : vector<1x32xf32> to vector<8x32xf32>
    %269 = arith.addf %266, %268 : vector<8x32xf32>
    %270 = vector.shape_cast %269 : vector<8x32xf32> to vector<1x8x32xf32>
    %271 = vector.shape_cast %270 : vector<1x8x32xf32> to vector<1x8x32xf32>
    %272 = vector.broadcast %271 : vector<1x8x32xf32> to vector<6x8x32xf32>
    %273 = tpu.iota {dimensions = array<i32: 0>} : vector<6x8xi32>
    %c1_i32 = arith.constant 1 : i32
    %274 = vector.broadcast %c1_i32 : i32 to vector<6x8xi32>
    %275 = arith.addi %273, %274 : vector<6x8xi32>
    %276 = arith.sitofp %275 : vector<6x8xi32> to vector<6x8xf32>
    %277 = vector.shape_cast %276 : vector<6x8xf32> to vector<6x8x1xf32>
    %c0_49 = arith.constant 0 : index
    %c0_50 = arith.constant 0 : index
    %278 = vector.load %arg6[%c0_49, %c0_50] : memref<1x32xf32, #tpu.memory_space<vmem>>, vector<1x32xf32>
    %279 = vector.shape_cast %278 : vector<1x32xf32> to vector<1x1x32xf32>
    %280 = vector.broadcast %277 : vector<6x8x1xf32> to vector<6x8x32xf32>
    %281 = vector.broadcast %279 : vector<1x1x32xf32> to vector<6x8x32xf32>
    %282 = arith.mulf %280, %281 : vector<6x8x32xf32>
    %283 = arith.addf %272, %282 : vector<6x8x32xf32>
    %284 = math.tanh %283 : vector<6x8x32xf32>
    %285 = vector.shape_cast %284 : vector<6x8x32xf32> to vector<48x32xf32>
    %c0_51 = arith.constant 0 : index
    %c0_52 = arith.constant 0 : index
    %286 = vector.load %arg8[%c0_51, %c0_52] : memref<32x16xf32, #tpu.memory_space<vmem>>, vector<32x16xf32>
    %cst_53 = arith.constant dense<0.000000e+00> : vector<48x16xf32>
    %287 = tpu.matmul %285, %286, %cst_53 {dimension_numbers = #tpu.dot_dimension_numbers<[1], [0], [0], [1], [0, 0, 1, 1], [], []>} : vector<48x32xf32>, vector<32x16xf32>, vector<48x16xf32> -> vector<48x16xf32>
    %c0_54 = arith.constant 0 : index
    %c0_55 = arith.constant 0 : index
    %288 = vector.load %arg9[%c0_54, %c0_55] : memref<1x16xf32, #tpu.memory_space<vmem>>, vector<1x16xf32>
    %289 = vector.broadcast %288 : vector<1x16xf32> to vector<48x16xf32>
    %290 = arith.addf %287, %289 : vector<48x16xf32>
    %291 = vector.shape_cast %290 : vector<48x16xf32> to vector<6x8x16xf32>
    %c0_56 = arith.constant 0 : index
    %c0_57 = arith.constant 0 : index
    %c0_58 = arith.constant 0 : index
    %292 = vector.load %arg10[%c0_56, %c0_57, %c0_58] : memref<6x8x16xf32, #tpu.memory_space<vmem>>, vector<6x8x16xf32>
    tpu.vector_store %arg10[%c0_56, %c0_57, %c0_58], %291 {strides = array<i32>} : memref<6x8x16xf32, #tpu.memory_space<vmem>>, vector<6x8x16xf32>,
    return
  }
}

</mosaic_0001>

<bundles_post_ra>
// kernel: tpu_custom_call.1
= control target key start
LH: loop header
LB: loop body
LE: loop exit
PB: predicated region body
PF: predicated region fallthrough
CT: control target
= control target key end

     0   :  { %15 = vsyncpa [#allocation3], 0  ;;  %s2038_s0 = inlined_call_operand.hbm [shape: f32[8,8,16], index: 0, kind: input, shape index: {}]   ;;  %s2039_s1 = inlined_call_operand.vmem [shape: f32[16,96], index: 1, kind: input, shape index: {}]   ;;  %s2040_s2 = inlined_call_operand.vmem [shape: f32[32,96], index: 2, kind: input, shape index: {}]   ;;  %s2041_s3 = inlined_call_operand.vmem [shape: f32[1,96], index: 3, kind: input, shape index: {}]   ;;  %s2042_s4 = inlined_call_operand.vmem [shape: f32[1,96], index: 4, kind: input, shape index: {}]   ;;  %s2043_s5 = inlined_call_operand.hbm [shape: f32[32,32], index: 5, kind: input, shape index: {}]   ;;  %s2044_s6 = inlined_call_operand.vmem [shape: f32[1,32], index: 6, kind: input, shape index: {}]   ;;  %s2045_s7 = inlined_call_operand.vmem [shape: f32[1,32], index: 7, kind: input, shape index: {}]   ;;  %s2046_s8 = inlined_call_operand.vmem [shape: f32[32,16], index: 8, kind: input, shape index: {}]   ;;  %s2047_s9 = inlined_call_operand.vmem [shape: f32[1,16], index: 9, kind: input, shape index: {}]   ;;  %s2048_s10 = inlined_call_operand.hbm [shape: f32[6,8,16], index: 10, kind: output, shape index: {}]  }
   0x1   :  { %16 = vsyncpa [#allocation6], 0 }
   0x2   :  { %17 = vsyncpa [#allocation4], 0  ;;  %s1704_s13 = smov [#allocation2]  }
   0x3   :  { %s23_s14 = sshll.u32 %s1704_s13, 4  ;;  %s24_s14 = int_to_ptr.vmem [resolvable:$true] %s23_s14 }
   0x4   :  { %s1646_s15 = scalar_lea.vmem %s24_s14, 1024  ;;  %p1651_p1 = scmp.lt.s32.totalorder %s24_s14, %s24_s14 }
   0x5   :  { %p1647_p0 = scmp.ne.s32.totalorder %s24_s14, %s1646_s15  ;;  %p1652_p2 = scmp.lt.s32.totalorder %s1646_s15, %s1646_s15 }
   0x7   :  { %p1653_p3 = por %p1652_p2, %p1651_p1 }
   0x9   :  { %p1654_p4 = pnand %p1653_p3, %p1647_p0 }
   0xb   :  { %1657 = shalt.err (!%p1654_p4)
}
   0xc   :  { %s1705_s16 = smov 128   ;;  %s1706_s17 = smov 8  }
   0xd   :  { %29 = dma.hbm_to_vmem [thread:$0]  %s2038_s0, 1024, %s24_s14, [#allocation3], %s1705_s16, %s1705_s16, %s1706_s17  }
   0xe   :  { %s1707_s20 = smov [#allocation5]  }
   0xf   :  { %s43_s21 = sshll.u32 %s1707_s20, 4  ;;  %s44_s21 = int_to_ptr.vmem [resolvable:$true] %s43_s21 }
  0x10   :  { %s1666_s22 = scalar_lea.vmem %s44_s21, 512  ;;  %p1671_p6 = scmp.lt.s32.totalorder %s44_s21, %s44_s21 }
  0x11   :  { %p1667_p5 = scmp.ne.s32.totalorder %s44_s21, %s1666_s22  ;;  %p1672_p7 = scmp.lt.s32.totalorder %s1666_s22, %s1666_s22 }
  0x13   :  { %p1673_p8 = por %p1672_p7, %p1671_p6 }
  0x15   :  { %p1674_p9 = pnand %p1673_p8, %p1667_p5 }
  0x17   :  { %1677 = shalt.err (!%p1674_p9)
}
  0x18   :  { %49 = dma.hbm_to_vmem [thread:$0]  %s2043_s5, 512, %s44_s21, [#allocation6], %s1705_s16, %s1705_s16, %s1706_s17  }
  0x19   :  { %1698 = dma.done.wait [#allocation3], 1024  }
  0x1a   :  { %1699 = vsyncadd [#allocation3], 4294966272 }
  0x1b   :  { %1700 = dma.done.wait [#allocation6], 512  }
  0x1c   :  { %1701 = vsyncadd [#allocation6], 4294966784  ;;  %v1708_v0 = vmov 0.0   ;;  %vm1709_vm0 = vmmov 0   ;;  %vm84_vm1 = vcmask 130048   ;;  %v77_v1 = vld [vmem:[%s2039_s1 + $0x8] sm:$0xff]  ;;  %v214_v15 = vlaneseq }
  0x1d   :  { %1464 = vmatprep.subr.mxu1 %v1708_v0  ;;  %1472 = vmatprep.mubr.msk.f32.mxu1 %vm1709_vm0, %v1708_v0  ;;  %v76_v2 = vld [vmem:[%s2039_s1] sm:$0xff]  ;;  %v1793_v4 = vld [vmem:[%s2040_s2 + $0x18] sm:$0xff]  ;;  %v65_v5 = vld [vmem:[#allocation2 + $0x8] sm:$0xff]  ;;  %vm74_vm2 = vcmask 523264   ;;  %vm230_vm3 = vcmask 261120   ;;  %s1712_s28 = smov [#allocation7]  }
  0x1e   :  { %v64_v3 = vld [vmem:[#allocation2] sm:$0xff]  ;;  %1437 = vmatprep.subr.mxu0 %v77_v1  ;;  %1465 = vmatpush3.msra.mxu1 %v1793_v4  ;;  %v66_v6 = vld [vmem:[#allocation2 + $0x10] sm:$0xff]  ;;  %v67_v8 = vld [vmem:[#allocation2 + $0x18] sm:$0xff]  ;;  %v1847_v16 = vshrl.u32 %v214_v15, 7  ;;  %s1325_s29 = sshll.u32 %s1712_s28, 4  ;;  %s1326_s29 = int_to_ptr.vmem [resolvable:$true] %s1325_s29 }
  0x1f   :  { %1441 = vmatprep.mubr.msk.f32.mxu0 %vm84_vm1, %v64_v3  ;;  %1438 = vmatpush3.msra.mxu0 %v77_v1  ;;  %v1799_v7 = vld [vmem:[%s2040_s2 + $0x10] sm:$0xff]  ;;  %v68_v9 = vld [vmem:[#allocation2 + $0x20] sm:$0xff]  ;;  %v1811_v10 = vld [vmem:[%s2040_s2 + $0x8] sm:$0xff]  ;;  %p1683_p11 = scmp.lt.s32.totalorder %s1326_s29, %s1326_s29 }
  0x20   :  { %1439 = vmatprep.subr.mxu0 %v76_v2  ;;  %1466 = vmatprep.subr.mxu1 %v1708_v0  ;;  %v1821_v11 = vld [vmem:[%s2040_s2] sm:$0xff]  ;;  %v69_v12 = vld [vmem:[#allocation2 + $0x28] sm:$0xff]  ;;  %v70_v13 = vld [vmem:[#allocation2 + $0x30] sm:$0xff]  ;;  %v1853_v18 = vsub.s32 0, %v1847_v16 }
  0x21   :  { %1440 = vmatpush3.msra.mxu0 %v76_v2  ;;  %1467 = vmatpush3.msra.mxu1 %v1799_v7  ;;  %v71_v14 = vld [vmem:[#allocation2 + $0x38] sm:$0xff]  ;;  %v73_v17 = vld [vmem:[%s2042_s4] sm:$0x1]  ;;  %s1711_s4 = smov 96  }
  0x22   :  { %1442 = vmatmul.mubr.msk.f32.vlgmr.msra.gmra.mxu0 %vm84_vm1, %v65_v5  ;;  %1453 = vmatprep.subr.mxu0 %v1708_v0  ;;  %v75_v19 = vsel %vm74_vm2, %v73_v17, 0.0  ;;  %v1338_v20 = vld [vmem:[%s2041_s3] ss:$0 sm:$0xff]  ;;  %v1870_v40 = vrot.slane %v73_v17, %v1853_v18  ;;  %s1710_s3 = smov 64  }
  0x23   :  { %1454 = vmatpush3.msra.mxu0 %v1793_v4  ;;  %1444 = vmatprep.mubr.msk.f32.mxu0 %vm84_vm1, %v66_v6  ;;  %v217_v21 = vrot.slane %v75_v19, %v1853_v18 }
  0x24   :  { %1455 = vmatprep.subr.mxu0 %v1708_v0  ;;  %1468 = vmatprep.subr.mxu1 %v1708_v0 }
  0x25   :  { %1456 = vmatpush3.msra.mxu0 %v1799_v7  ;;  %1469 = vmatpush3.msra.mxu1 %v1811_v10 }
  0x26   :  { %1445 = vmatmul.mubr.msk.f32.gmra.mxu0 %vm84_vm1, %v67_v8  ;;  %1457 = vmatprep.subr.mxu0 %v1708_v0 }
  0x27   :  { %1447 = vmatprep.mubr.msk.f32.mxu0 %vm84_vm1, %v68_v9  ;;  %1458 = vmatpush3.msra.mxu0 %v1811_v10 }
  0x28   :  { %1459 = vmatprep.subr.mxu0 %v1708_v0  ;;  %1470 = vmatprep.subr.mxu1 %v1708_v0 }
  0x29   :  { %1460 = vmatpush3.msra.mxu0 %v1821_v11  ;;  %1471 = vmatpush3.msra.mxu1 %v1821_v11 }
  0x2a   :  { %1448 = vmatmul.mubr.msk.f32.gmra.mxu0 %vm84_vm1, %v69_v12  ;;  %1475 = vmatprep.subr.mxu0 %v1708_v0 }
  0x2b   :  { %1450 = vmatprep.mubr.msk.f32.mxu0 %vm84_vm1, %v70_v13  ;;  %1486 = vmatprep.subr.mxu1 %v1708_v0 }
  0x2e   :  { %1451 = vmatmul.mubr.msk.f32.gmra.mxu0 %vm84_vm1, %v71_v14 }
  0x2f   :  { %1461 = vmatprep.mubr.msk.f32.mxu0 %vm1709_vm0, %v1708_v0 }
  0x32   :  { %1462 = vmatmul.mubr.f32.vlgmr.msra.gmra.mxu0 %v1708_v0 }
  0x33   :  { %1476 = vmatpush3.msra.mxu0 %v1793_v4  ;;  %1483 = vmatprep.mubr.msk.f32.mxu0 %vm1709_vm0, %v1708_v0 }
  0x34   :  { %1477 = vmatprep.subr.mxu0 %v1708_v0 }
  0x35   :  { %1478 = vmatpush3.msra.mxu0 %v1799_v7 }
  0x36   :  { %1479 = vmatprep.subr.mxu0 %v1708_v0 }
  0x37   :  { %1480 = vmatpush3.msra.mxu0 %v1811_v10 }
  0x38   :  { %1481 = vmatprep.subr.mxu0 %v1708_v0 }
  0x39   :  { %1482 = vmatpush3.msra.mxu0 %v1821_v11 }
  0x3a   :  { %1497 = vmatprep.subr.mxu0 %v1708_v0 }
  0xe2   :  { %v1443_v22 = vpop.f32.mrf.mxu0 }
  0xe3   :  { %v181_v23 = vadd.f32 %v1443_v22, %v1338_v20 }
  0xe4   :  { %v175_v24 = vpop.f32.mrf.mxu0 }
  0xe5   :  { %v1859_v25 = vadd.f32 %v217_v21, %v181_v23  ;;  %v176_v48 = vadd.f32 %v1338_v20, %v175_v24 }
  0xe6   :  { %v1446_v26 = vpop.f32.mrf.mxu0 }
  0xe7   :  { %v191_v27 = vadd.f32 %v1446_v26, %v1338_v20  ;;  %v218_v49 = vadd.f32 %v217_v21, %v176_v48 }
  0xe8   :  { %v185_v28 = vpop.f32.mrf.mxu0 }
  0xe9   :  { %v1861_v29 = vadd.f32 %v217_v21, %v191_v27  ;;  %v186_v30 = vadd.f32 %v1338_v20, %v185_v28 }
  0xea   :  { %v1449_v31 = vpop.f32.mrf.mxu0 }
  0xeb   :  { %v1863_v32 = vadd.f32 %v217_v21, %v186_v30  ;;  %v201_v33 = vadd.f32 %v1449_v31, %v1338_v20 }
  0xec   :  { %v195_v34 = vpop.f32.mrf.mxu0 }
  0xed   :  { %v1865_v35 = vadd.f32 %v217_v21, %v201_v33  ;;  %v196_v36 = vadd.f32 %v1338_v20, %v195_v34 }
  0xee   :  { %v1452_v37 = vpop.f32.mrf.mxu0 }
  0xef   :  { %v1867_v38 = vadd.f32 %v217_v21, %v196_v36  ;;  %v211_v39 = vadd.f32 %v1452_v37, %v1338_v20 }
  0xf0   :  { %v205_v41 = vpop.f32.mrf.mxu0 }
  0xf1   :  { %v1872_v42 = vadd.f32 %v217_v21, %v211_v39  ;;  %v206_v43 = vadd.f32 %v1338_v20, %v205_v41 }
  0xf2   :  { %v300_v44 = vpop.f32.mrf.mxu0 }
  0xf3   :  { %v1874_v45 = vadd.f32 %v217_v21, %v206_v43  ;;  %v310_v46 = vadd.f32 %v1870_v40, %v300_v44  ;;  %v311_v50 = vadd.f32 %v300_v44, %v218_v49 }
  0xf4   :  { %v1463_v47 = vpop.f32.mrf.mxu0 }
  0xf5   :  { %319 = vrot.lane.b32.xlu0 %v310_v46, %s1710_s3  ;;  %v1347_v51 = vmul.f32 -1.442695, %v311_v50 }
  0xf7   :  { %1578 = vpow2.f32 %v1347_v51 }
 0x104   :  { %v1579_v52 = vpop.eup %1578 }
 0x105   :  { %v315_v53 = vadd.f32 1.0, %v1579_v52 }
 0x107   :  { %1580 = vrcp.f32 %v315_v53 }
 0x114   :  { %v1581_v54 = vpop.eup %1580 }
 0x115   :  { %v329_v60 = vsub.f32 1.0, %v1581_v54  ;;  %v335_v62 = vmul.f32 0.0, %v1581_v54 }
 0x167   :  { %v320_v55 = vpop.permute.xlu0 %319 }
 0x168   :  { %v322_v56 = vmul.f32 %v1581_v54, %v320_v55 }
 0x16a   :  { %324 = vrot.lane.b32.xlu0 %v322_v56, %s1710_s3 }
 0x1dc   :  { %v325_v57 = vpop.permute.xlu0 %324 }
 0x1dd   :  { %v327_v58 = vadd.f32 %v325_v57, %v218_v49 }
 0x1df   :  { %1582 = vtanh.f32 %v327_v58 }
 0x1ec   :  { %v1583_v59 = vpop.eup %1582 }
 0x1ed   :  { %331 = vrot.lane.b32.xlu1 %v1583_v59, %s1711_s4 }
 0x25f   :  { %v332_v61 = vpop.permute.xlu1 %331 }
 0x260   :  { %v334_v63 = vmul.f32 %v332_v61, %v329_v60 }
 0x262   :  { %v336_v1 = vadd.f32 %v335_v62, %v334_v63 }
 0x264   :  { %338 = vrot.lane.b32.xlu1 %v336_v1, %s1711_s4 }
 0x2d6   :  { %v339_v2 = vpop.permute.xlu1 %338 }
 0x2d7   :  { %1473 = vmatmul.mubr.msk.f32.vlgmr.msra.gmra.mxu1 %vm230_vm3, %v339_v2 }
 0x2d8   :  { %1487 = vmatpush3.msra.mxu1 %v1793_v4  ;;  %1494 = vmatprep.mubr.msk.f32.mxu1 %vm1709_vm0, %v1708_v0 }
 0x2d9   :  { %1488 = vmatprep.subr.mxu1 %v1708_v0 }
 0x2da   :  { %1489 = vmatpush3.msra.mxu1 %v1799_v7 }
 0x2db   :  { %1490 = vmatprep.subr.mxu1 %v1708_v0 }
 0x2dc   :  { %1491 = vmatpush3.msra.mxu1 %v1811_v10 }
 0x2dd   :  { %1492 = vmatprep.subr.mxu1 %v1708_v0 }
 0x2de   :  { %1493 = vmatpush3.msra.mxu1 %v1821_v11 }
 0x2df   :  { %1508 = vmatprep.subr.mxu1 %v1708_v0 }
 0x397   :  { %v408_v3 = vpop.f32.mrf.mxu1 }
 0x398   :  { %v412_v5 = vadd.f32 %v408_v3, %v1870_v40  ;;  %v413_v8 = vadd.f32 %v408_v3, %v1859_v25 }
 0x399   :  { %v1474_v6 = vpop.f32.mrf.mxu1 }
 0x39a   :  { %421 = vrot.lane.b32.xlu0 %v412_v5, %s1710_s3  ;;  %v1349_v9 = vmul.f32 -1.442695, %v413_v8 }
 0x39c   :  { %1584 = vpow2.f32 %v1349_v9 }
 0x3a9   :  { %v1585_v12 = vpop.eup %1584 }
 0x3aa   :  { %v417_v13 = vadd.f32 1.0, %v1585_v12 }
 0x3ac   :  { %1586 = vrcp.f32 %v417_v13 }
 0x3b9   :  { %v1587_v14 = vpop.eup %1586 }
 0x3ba   :  { %v431_v22 = vsub.f32 1.0, %v1587_v14  ;;  %v437_v24 = vmul.f32 %v1587_v14, %v336_v1 }
 0x40c   :  { %v422_v15 = vpop.permute.xlu0 %421 }
 0x40d   :  { %v424_v17 = vmul.f32 %v1587_v14, %v422_v15 }
 0x40f   :  { %426 = vrot.lane.b32.xlu1 %v424_v17, %s1710_s3 }
 0x481   :  { %v427_v19 = vpop.permute.xlu1 %426 }
 0x482   :  { %v429_v20 = vadd.f32 %v427_v19, %v1859_v25 }
 0x484   :  { %1588 = vtanh.f32 %v429_v20 }
 0x491   :  { %v1589_v21 = vpop.eup %1588 }
 0x492   :  { %433 = vrot.lane.b32.xlu0 %v1589_v21, %s1711_s4 }
 0x504   :  { %v434_v23 = vpop.permute.xlu0 %433 }
 0x505   :  { %v436_v26 = vmul.f32 %v434_v23, %v431_v22 }
 0x507   :  { %v438_v27 = vadd.f32 %v437_v24, %v436_v26 }
 0x509   :  { %440 = vrot.lane.b32.xlu1 %v438_v27, %s1711_s4 }
 0x57b   :  { %v441_v28 = vpop.permute.xlu1 %440 }
 0x57c   :  { %1484 = vmatmul.mubr.msk.f32.vlgmr.msra.gmra.mxu0 %vm230_vm3, %v441_v28 }
 0x57d   :  { %1498 = vmatpush3.msra.mxu0 %v1793_v4  ;;  %1505 = vmatprep.mubr.msk.f32.mxu0 %vm1709_vm0, %v1708_v0 }
 0x57e   :  { %1499 = vmatprep.subr.mxu0 %v1708_v0 }
 0x57f   :  { %1500 = vmatpush3.msra.mxu0 %v1799_v7 }
 0x580   :  { %1501 = vmatprep.subr.mxu0 %v1708_v0 }
 0x581   :  { %1502 = vmatpush3.msra.mxu0 %v1811_v10 }
 0x582   :  { %1503 = vmatprep.subr.mxu0 %v1708_v0 }
 0x583   :  { %1504 = vmatpush3.msra.mxu0 %v1821_v11 }
 0x584   :  { %1519 = vmatprep.subr.mxu0 %v1708_v0 }
 0x63c   :  { %v510_v25 = vpop.f32.mrf.mxu0 }
 0x63d   :  { %v514_v30 = vadd.f32 %v510_v25, %v1870_v40  ;;  %v515_v33 = vadd.f32 %v510_v25, %v1863_v32 }
 0x63e   :  { %v1485_v31 = vpop.f32.mrf.mxu0 }
 0x63f   :  { %523 = vrot.lane.b32.xlu0 %v514_v30, %s1710_s3  ;;  %v1351_v34 = vmul.f32 -1.442695, %v515_v33 }
 0x641   :  { %1590 = vpow2.f32 %v1351_v34 }
 0x64e   :  { %v1591_v36 = vpop.eup %1590 }
 0x64f   :  { %v519_v37 = vadd.f32 1.0, %v1591_v36 }
 0x651   :  { %1592 = vrcp.f32 %v519_v37 }
 0x65e   :  { %v1593_v39 = vpop.eup %1592 }
 0x65f   :  { %v533_v48 = vsub.f32 1.0, %v1593_v39  ;;  %v539_v50 = vmul.f32 %v1593_v39, %v438_v27 }
 0x6b1   :  { %v524_v41 = vpop.permute.xlu0 %523 }
 0x6b2   :  { %v526_v43 = vmul.f32 %v1593_v39, %v524_v41 }
 0x6b4   :  { %528 = vrot.lane.b32.xlu1 %v526_v43, %s1710_s3 }
 0x726   :  { %v529_v44 = vpop.permute.xlu1 %528 }
 0x727   :  { %v531_v46 = vadd.f32 %v529_v44, %v1863_v32 }
 0x729   :  { %1594 = vtanh.f32 %v531_v46 }
 0x736   :  { %v1595_v47 = vpop.eup %1594 }
 0x737   :  { %535 = vrot.lane.b32.xlu0 %v1595_v47, %s1711_s4 }
 0x7a9   :  { %v536_v49 = vpop.permute.xlu0 %535 }
 0x7aa   :  { %v538_v51 = vmul.f32 %v536_v49, %v533_v48 }
 0x7ac   :  { %v540_v52 = vadd.f32 %v539_v50, %v538_v51 }
 0x7ae   :  { %542 = vrot.lane.b32.xlu1 %v540_v52, %s1711_s4 }
 0x820   :  { %v543_v53 = vpop.permute.xlu1 %542 }
 0x821   :  { %1495 = vmatmul.mubr.msk.f32.vlgmr.msra.gmra.mxu1 %vm230_vm3, %v543_v53 }
 0x822   :  { %1509 = vmatpush3.msra.mxu1 %v1793_v4  ;;  %1516 = vmatprep.mubr.msk.f32.mxu1 %vm1709_vm0, %v1708_v0 }
 0x823   :  { %1510 = vmatprep.subr.mxu1 %v1708_v0 }
 0x824   :  { %1511 = vmatpush3.msra.mxu1 %v1799_v7 }
 0x825   :  { %1512 = vmatprep.subr.mxu1 %v1708_v0 }
 0x826   :  { %1513 = vmatpush3.msra.mxu1 %v1811_v10 }
 0x827   :  { %1514 = vmatprep.subr.mxu1 %v1708_v0 }
 0x828   :  { %1515 = vmatpush3.msra.mxu1 %v1821_v11 }
 0x829   :  { %1530 = vmatprep.subr.mxu1 %v1708_v0 }
 0x8e1   :  { %v612_v32 = vpop.f32.mrf.mxu1 }
 0x8e2   :  { %v616_v54 = vadd.f32 %v612_v32, %v1870_v40  ;;  %v617_v56 = vadd.f32 %v612_v32, %v1861_v29 }
 0x8e3   :  { %v1496_v55 = vpop.f32.mrf.mxu1 }
 0x8e4   :  { %625 = vrot.lane.b32.xlu0 %v616_v54, %s1710_s3  ;;  %v1353_v57 = vmul.f32 -1.442695, %v617_v56 }
 0x8e6   :  { %1596 = vpow2.f32 %v1353_v57 }
 0x8f3   :  { %v1597_v58 = vpop.eup %1596 }
 0x8f4   :  { %v621_v59 = vadd.f32 1.0, %v1597_v58 }
 0x8f6   :  { %1598 = vrcp.f32 %v621_v59 }
 0x903   :  { %v1599_v60 = vpop.eup %1598 }
 0x904   :  { %v635_v3 = vsub.f32 1.0, %v1599_v60  ;;  %v641_v6 = vmul.f32 %v1599_v60, %v540_v52 }
 0x956   :  { %v626_v61 = vpop.permute.xlu0 %625 }
 0x957   :  { %v628_v62 = vmul.f32 %v1599_v60, %v626_v61 }
 0x959   :  { %630 = vrot.lane.b32.xlu1 %v628_v62, %s1710_s3 }
 0x9cb   :  { %v631_v63 = vpop.permute.xlu1 %630 }
 0x9cc   :  { %v633_v1 = vadd.f32 %v631_v63, %v1861_v29 }
 0x9ce   :  { %1600 = vtanh.f32 %v633_v1 }
 0x9db   :  { %v1601_v2 = vpop.eup %1600 }
 0x9dc   :  { %637 = vrot.lane.b32.xlu0 %v1601_v2, %s1711_s4 }
 0xa4e   :  { %v638_v5 = vpop.permute.xlu0 %637 }
 0xa4f   :  { %v640_v8 = vmul.f32 %v638_v5, %v635_v3 }
 0xa51   :  { %v642_v9 = vadd.f32 %v641_v6, %v640_v8 }
 0xa53   :  { %644 = vrot.lane.b32.xlu1 %v642_v9, %s1711_s4 }
 0xac5   :  { %v645_v12 = vpop.permute.xlu1 %644 }
 0xac6   :  { %1506 = vmatmul.mubr.msk.f32.vlgmr.msra.gmra.mxu0 %vm230_vm3, %v645_v12 }
 0xac7   :  { %1520 = vmatpush3.msra.mxu0 %v1793_v4  ;;  %1527 = vmatprep.mubr.msk.f32.mxu0 %vm1709_vm0, %v1708_v0 }
 0xac8   :  { %1521 = vmatprep.subr.mxu0 %v1708_v0 }
 0xac9   :  { %1522 = vmatpush3.msra.mxu0 %v1799_v7 }
 0xaca   :  { %1523 = vmatprep.subr.mxu0 %v1708_v0 }
 0xacb   :  { %1524 = vmatpush3.msra.mxu0 %v1811_v10 }
 0xacc   :  { %1525 = vmatprep.subr.mxu0 %v1708_v0 }
 0xacd   :  { %1526 = vmatpush3.msra.mxu0 %v1821_v11 }
 0xace   :  { %1541 = vmatprep.subr.mxu0 %v1708_v0 }
 0xb86   :  { %v714_v29 = vpop.f32.mrf.mxu0 }
 0xb87   :  { %v718_v13 = vadd.f32 %v714_v29, %v1870_v40  ;;  %v719_v15 = vadd.f32 %v714_v29, %v1867_v38 }
 0xb88   :  { %v1507_v14 = vpop.f32.mrf.mxu0 }
 0xb89   :  { %727 = vrot.lane.b32.xlu0 %v718_v13, %s1710_s3  ;;  %v1355_v17 = vmul.f32 -1.442695, %v719_v15 }
 0xb8b   :  { %1602 = vpow2.f32 %v1355_v17 }
 0xb98   :  { %v1603_v19 = vpop.eup %1602 }
 0xb99   :  { %v723_v20 = vadd.f32 1.0, %v1603_v19 }
 0xb9b   :  { %1604 = vrcp.f32 %v723_v20 }
 0xba8   :  { %v1605_v21 = vpop.eup %1604 }
 0xba9   :  { %v737_v28 = vsub.f32 1.0, %v1605_v21  ;;  %v743_v30 = vmul.f32 %v1605_v21, %v642_v9 }
 0xbfb   :  { %v728_v22 = vpop.permute.xlu0 %727 }
 0xbfc   :  { %v730_v23 = vmul.f32 %v1605_v21, %v728_v22 }
 0xbfe   :  { %732 = vrot.lane.b32.xlu1 %v730_v23, %s1710_s3 }
 0xc70   :  { %v733_v24 = vpop.permute.xlu1 %732 }
 0xc71   :  { %v735_v26 = vadd.f32 %v733_v24, %v1867_v38  ;;  %v1053_v24 = vld [vmem:[#allocation5 + $0x10] sm:$0xff] }
 0xc73   :  { %1606 = vtanh.f32 %v735_v26  ;;  %v1052_v26 = vld [vmem:[#allocation5 + $0x8] sm:$0xff] }
 0xc80   :  { %v1607_v27 = vpop.eup %1606 }
 0xc81   :  { %739 = vrot.lane.b32.xlu0 %v1607_v27, %s1711_s4  ;;  %v1051_v27 = vld [vmem:[#allocation5] sm:$0xff] }
 0xcf3   :  { %v740_v25 = vpop.permute.xlu0 %739 }
 0xcf4   :  { %v742_v31 = vmul.f32 %v740_v25, %v737_v28 }
 0xcf6   :  { %v744_v33 = vadd.f32 %v743_v30, %v742_v31 }
 0xcf8   :  { %746 = vrot.lane.b32.xlu1 %v744_v33, %s1711_s4 }
 0xd6a   :  { %v747_v34 = vpop.permute.xlu1 %746 }
 0xd6b   :  { %1517 = vmatmul.mubr.msk.f32.vlgmr.msra.gmra.mxu1 %vm230_vm3, %v747_v34 }
 0xd6c   :  { %1531 = vmatpush3.msra.mxu1 %v1793_v4  ;;  %1538 = vmatprep.mubr.msk.f32.mxu1 %vm1709_vm0, %v1708_v0 }
 0xd6d   :  { %1532 = vmatprep.subr.mxu1 %v1708_v0 }
 0xd6e   :  { %1533 = vmatpush3.msra.mxu1 %v1799_v7 }
 0xd6f   :  { %1534 = vmatprep.subr.mxu1 %v1708_v0 }
 0xd70   :  { %1535 = vmatpush3.msra.mxu1 %v1811_v10 }
 0xd71   :  { %1536 = vmatprep.subr.mxu1 %v1708_v0 }
 0xd72   :  { %1537 = vmatpush3.msra.mxu1 %v1821_v11 }
 0xe2b   :  { %v816_v38 = vpop.f32.mrf.mxu1 }
 0xe2c   :  { %v820_v36 = vadd.f32 %v816_v38, %v1870_v40  ;;  %v821_v4 = vadd.f32 %v816_v38, %v1865_v35  ;;  %v1193_v38 = vld [vmem:[%s2046_s8 + $0x18] sm:$0xff] }
 0xe2d   :  { %v1518_v37 = vpop.f32.mrf.mxu1  ;;  %1552 = vmatprep.subr.mxu1 %v1193_v38 }
 0xe2e   :  { %829 = vrot.lane.b32.xlu0 %v820_v36, %s1710_s3  ;;  %v1357_v39 = vmul.f32 -1.442695, %v821_v4  ;;  %v1191_v36 = vld [vmem:[%s2046_s8 + $0x8] sm:$0xff]  ;;  %v1190_v37 = vld [vmem:[%s2046_s8] sm:$0xff]  ;;  %v1139_v4 = vadd.s32 1, %v1847_v16 }
 0xe30   :  { %1608 = vpow2.f32 %v1357_v39  ;;  %v1140_v39 = vcvt.s32.f32 %v1139_v4 }
 0xe3d   :  { %v1609_v41 = vpop.eup %1608 }
 0xe3e   :  { %v825_v7 = vadd.f32 1.0, %v1609_v41  ;;  %v1147_v41 = vsub.s32 1, %v1847_v16 }
 0xe40   :  { %1610 = vrcp.f32 %v825_v7  ;;  %v1151_v7 = vsub.s32 2, %v1847_v16 }
 0xe4d   :  { %v1611_v43 = vpop.eup %1610 }
 0xe4e   :  { %v839_v48 = vsub.f32 1.0, %v1611_v43  ;;  %v845_v50 = vmul.f32 %v1611_v43, %v744_v33 }
 0xea0   :  { %v830_v44 = vpop.permute.xlu0 %829 }
 0xea1   :  { %v832_v10 = vmul.f32 %v1611_v43, %v830_v44  ;;  %v1155_v43 = vsub.s32 3, %v1847_v16  ;;  %v1144_v44 = vrot.slane %v1140_v39, %v1853_v18 }
 0xea3   :  { %834 = vrot.lane.b32.xlu1 %v832_v10, %s1710_s3  ;;  %v1148_v10 = vrot.slane %v1140_v39, %v1147_v41 }
 0xf15   :  { %v835_v46 = vpop.permute.xlu1 %834 }
 0xf16   :  { %v837_v11 = vadd.f32 %v835_v46, %v1865_v35  ;;  %v1152_v46 = vrot.slane %v1140_v39, %v1151_v7 }
 0xf18   :  { %1612 = vtanh.f32 %v837_v11  ;;  %v1159_v11 = vsub.s32 4, %v1847_v16 }
 0xf25   :  { %v1613_v47 = vpop.eup %1612 }
 0xf26   :  { %841 = vrot.lane.b32.xlu0 %v1613_v47, %s1711_s4  ;;  %v1364_v47 = vld [vmem:[%s2044_s6] ss:$0 sm:$0xff] }
 0xf98   :  { %v842_v49 = vpop.permute.xlu0 %841 }
 0xf99   :  { %v844_v51 = vmul.f32 %v842_v49, %v839_v48  ;;  %v1362_v48 = vld [vmem:[%s2045_s7] ss:$0 sm:$0xff]  ;;  %v1156_v49 = vrot.slane %v1140_v39, %v1155_v43 }
 0xf9b   :  { %v846_v52 = vadd.f32 %v845_v50, %v844_v51  ;;  %v1163_v50 = vsub.s32 5, %v1847_v16  ;;  %v1160_v51 = vrot.slane %v1140_v39, %v1159_v11 }
 0xf9d   :  { %848 = vrot.lane.b32.xlu1 %v846_v52, %s1711_s4 }
0x100f   :  { %v849_v53 = vpop.permute.xlu1 %848 }
0x1010   :  { %1528 = vmatmul.mubr.msk.f32.vlgmr.msra.gmra.mxu0 %vm230_vm3, %v849_v53  ;;  %v1173_v53 = vmul.f32 %v1364_v47, %v1148_v10 }
0x1011   :  { %1549 = vmatprep.mubr.msk.f32.mxu0 %vm1709_vm0, %v1708_v0 }
0x10d0   :  { %v918_v32 = vpop.f32.mrf.mxu0 }
0x10d1   :  { %v922_v35 = vadd.f32 %v918_v32, %v1870_v40  ;;  %v923_v55 = vadd.f32 %v918_v32, %v1874_v45  ;;  %v1174_v32 = vmul.f32 %v1364_v47, %v1152_v46 }
0x10d2   :  { %v1529_v54 = vpop.f32.mrf.mxu0 }
0x10d3   :  { %931 = vrot.lane.b32.xlu0 %v922_v35, %s1710_s3  ;;  %v1359_v56 = vmul.f32 -1.442695, %v923_v55  ;;  %v1164_v54 = vrot.slane %v1140_v39, %v1163_v50  ;;  %v1175_v55 = vmul.f32 %v1364_v47, %v1156_v49 }
0x10d5   :  { %1614 = vpow2.f32 %v1359_v56 }
0x10e2   :  { %v1615_v57 = vpop.eup %1614 }
0x10e3   :  { %v927_v58 = vadd.f32 1.0, %v1615_v57  ;;  %v1176_v57 = vmul.f32 %v1364_v47, %v1160_v51 }
0x10e5   :  { %1616 = vrcp.f32 %v927_v58 }
0x10f2   :  { %v1617_v59 = vpop.eup %1616 }
0x10f3   :  { %v941_v2 = vsub.f32 1.0, %v1617_v59  ;;  %v947_v5 = vmul.f32 %v1617_v59, %v846_v52  ;;  %v1172_v52 = vmul.f32 %v1364_v47, %v1144_v44 }
0x1145   :  { %v932_v60 = vpop.permute.xlu0 %931 }
0x1146   :  { %v934_v61 = vmul.f32 %v1617_v59, %v932_v60 }
0x1148   :  { %936 = vrot.lane.b32.xlu1 %v934_v61, %s1710_s3  ;;  %v1177_v61 = vmul.f32 %v1364_v47, %v1164_v54 }
0x11ba   :  { %v937_v62 = vpop.permute.xlu1 %936 }
0x11bb   :  { %v939_v63 = vadd.f32 %v937_v62, %v1874_v45 }
0x11bd   :  { %1618 = vtanh.f32 %v939_v63 }
0x11ca   :  { %v1619_v1 = vpop.eup %1618 }
0x11cb   :  { %943 = vrot.lane.b32.xlu0 %v1619_v1, %s1711_s4 }
0x123d   :  { %v944_v3 = vpop.permute.xlu0 %943 }
0x123e   :  { %v946_v6 = vmul.f32 %v944_v3, %v941_v2 }
0x1240   :  { %v948_v8 = vadd.f32 %v947_v5, %v946_v6 }
0x1242   :  { %950 = vrot.lane.b32.xlu1 %v948_v8, %s1711_s4 }
0x12b4   :  { %v951_v9 = vpop.permute.xlu1 %950 }
0x12b5   :  { %1539 = vmatmul.mubr.msk.f32.vlgmr.msra.gmra.mxu1 %vm230_vm3, %v951_v9  ;;  %v1365_v9 = vld [vmem:[%s2047_s9] ss:$0 sm:$0xff]  ;;  %s1678_s9 = scalar_lea.vmem %s1326_s29, 768 }
0x12b6   :  { %1553 = vmatpush3.msra.mxu1 %v1193_v38  ;;  %p1679_p10 = scmp.ne.s32.totalorder %s1326_s29, %s1678_s9  ;;  %p1684_p12 = scmp.lt.s32.totalorder %s1678_s9, %s1678_s9 }
0x12b8   :  { %p1685_p13 = por %p1684_p12, %p1683_p11 }
0x12ba   :  { %p1686_p0 = pnand %p1685_p13, %p1679_p10 }
0x1375   :  { %v1020_v12 = vpop.f32.mrf.mxu1 }
0x1376   :  { %v1024_v29 = vadd.f32 %v1020_v12, %v1870_v40  ;;  %v1025_v45 = vadd.f32 %v1020_v12, %v1872_v42  ;;  %v1054_v40 = vld [vmem:[#allocation5 + $0x18] sm:$0xff] }
0x1377   :  { %v1540_v13 = vpop.f32.mrf.mxu1  ;;  %1542 = vmatpush3.msra.mxu0 %v1054_v40 }
0x1378   :  { %1033 = vrot.lane.b32.xlu0 %v1024_v29, %s1710_s3  ;;  %v1361_v14 = vmul.f32 -1.442695, %v1025_v45  ;;  %1543 = vmatprep.subr.mxu0 %v1708_v0 }
0x1379   :  { %1544 = vmatpush3.msra.mxu0 %v1053_v24 }
0x137a   :  { %1620 = vpow2.f32 %v1361_v14  ;;  %1545 = vmatprep.subr.mxu0 %v1708_v0 }
0x137b   :  { %1546 = vmatpush3.msra.mxu0 %v1052_v26 }
0x137c   :  { %1547 = vmatprep.subr.mxu0 %v1708_v0  ;;  %v1192_v0 = vld [vmem:[%s2046_s8 + $0x10] sm:$0xff] }
0x137d   :  { %1548 = vmatpush3.msra.mxu0 %v1051_v27  ;;  %1554 = vmatprep.subr.mxu1 %v1192_v0 }
0x137e   :  { %1555 = vmatpush3.msra.mxu1 %v1192_v0 }
0x137f   :  { %1556 = vmatprep.subr.mxu1 %v1191_v36 }
0x1380   :  { %1557 = vmatpush3.msra.mxu1 %v1191_v36 }
0x1381   :  { %1558 = vmatprep.subr.mxu1 %v1190_v37 }
0x1382   :  { %1559 = vmatpush3.msra.mxu1 %v1190_v37 }
0x1387   :  { %v1621_v15 = vpop.eup %1620 }
0x1388   :  { %v1029_v17 = vadd.f32 1.0, %v1621_v15 }
0x138a   :  { %1622 = vrcp.f32 %v1029_v17 }
0x1397   :  { %v1623_v19 = vpop.eup %1622 }
0x1398   :  { %v1043_v25 = vsub.f32 1.0, %v1623_v19  ;;  %v1049_v30 = vmul.f32 %v1623_v19, %v948_v8 }
0x13ea   :  { %v1034_v20 = vpop.permute.xlu0 %1033 }
0x13eb   :  { %v1036_v21 = vmul.f32 %v1623_v19, %v1034_v20 }
0x13ed   :  { %1038 = vrot.lane.b32.xlu1 %v1036_v21, %s1710_s3 }
0x145f   :  { %v1039_v22 = vpop.permute.xlu1 %1038 }
0x1460   :  { %v1041_v23 = vadd.f32 %v1039_v22, %v1872_v42 }
0x1462   :  { %1624 = vtanh.f32 %v1041_v23 }
0x146f   :  { %v1625_v28 = vpop.eup %1624 }
0x1470   :  { %1045 = vrot.lane.b32.xlu0 %v1625_v28, %s1711_s4 }
0x14e2   :  { %v1046_v42 = vpop.permute.xlu0 %1045 }
0x14e3   :  { %v1048_v31 = vmul.f32 %v1046_v42, %v1043_v25 }
0x14e5   :  { %v1050_v33 = vadd.f32 %v1049_v30, %v1048_v31 }
0x14e7   :  { %1063 = vrot.lane.b32.xlu1 %v1050_v33, %s1711_s4 }
0x1559   :  { %v1064_v34 = vpop.permute.xlu1 %1063 }
0x155a   :  { %1550 = vmatmul.mubr.msk.f32.vlgmr.msra.gmra.mxu0 %vm230_vm3, %v1064_v34 }
0x161a   :  { %v1133_v18 = vpop.f32.mrf.mxu0 }
0x161b   :  { %v1134_v35 = vadd.f32 %v1362_v48, %v1133_v18 }
0x161c   :  { %v1551_v56 = vpop.f32.mrf.mxu0 }
0x161d   :  { %v1178_v58 = vadd.f32 %v1172_v52, %v1134_v35  ;;  %v1179_v59 = vadd.f32 %v1173_v53, %v1134_v35  ;;  %v1180_v60 = vadd.f32 %v1174_v32, %v1134_v35  ;;  %v1181_v62 = vadd.f32 %v1175_v55, %v1134_v35 }
0x161e   :  { %v1182_v63 = vadd.f32 %v1176_v57, %v1134_v35  ;;  %v1183_v16 = vadd.f32 %v1177_v61, %v1134_v35 }
0x161f   :  { %1626 = vtanh.f32 %v1178_v58 }
0x1620   :  { %1628 = vtanh.f32 %v1179_v59 }
0x1621   :  { %1630 = vtanh.f32 %v1180_v60 }
0x1622   :  { %1632 = vtanh.f32 %v1181_v62 }
0x1623   :  { %1634 = vtanh.f32 %v1182_v63 }
0x1624   :  { %1636 = vtanh.f32 %v1183_v16 }
0x162c   :  { %v1627_v1 = vpop.eup %1626 }
0x162d   :  { %v1629_v2 = vpop.eup %1628  ;;  %1560 = vmatprep.mubr.msk.f32.mxu1 %vm230_vm3, %v1627_v1 }
0x162e   :  { %v1631_v3 = vpop.eup %1630  ;;  %1561 = vmatmul.mubr.msk.f32.vlgmr.msra.gmra.mxu1 %vm230_vm3, %v1629_v2 }
0x162f   :  { %1563 = vmatprep.mubr.msk.f32.mxu1 %vm230_vm3, %v1631_v3  ;;  %v1633_v5 = vpop.eup %1632 }
0x1630   :  { %v1635_v6 = vpop.eup %1634 }
0x1631   :  { %v1637_v8 = vpop.eup %1636 }
0x1632   :  { %1564 = vmatmul.mubr.msk.f32.gmra.mxu1 %vm230_vm3, %v1633_v5 }
0x1633   :  { %1566 = vmatprep.mubr.msk.f32.mxu1 %vm230_vm3, %v1635_v6 }
0x1636   :  { %1567 = vmatmul.mubr.msk.f32.gmra.mxu1 %vm230_vm3, %v1637_v8 }
0x16ee   :  { %v1562_v12 = vpop.f32.mrf.mxu1 }
0x16ef   :  { %v1291_v29 = vadd.f32 %v1562_v12, %v1365_v9 }
0x16f0   :  { %v1285_v13 = vpop.f32.mrf.mxu1 }
0x16f1   :  { %1315 = vst.msk [vmem:[#allocation7 + $0x8] sm:$0xff] %vm84_vm1, %v1291_v29  ;;  %v1286_v45 = vadd.f32 %v1365_v9, %v1285_v13 }
0x16f2   :  { %v1565_v14 = vpop.f32.mrf.mxu1 }
0x16f3   :  { %1314 = vst.msk [vmem:[#allocation7] sm:$0xff] %vm84_vm1, %v1286_v45  ;;  %v1301_v15 = vadd.f32 %v1565_v14, %v1365_v9 }
0x16f4   :  { %v1295_v17 = vpop.f32.mrf.mxu1 }
0x16f5   :  { %1317 = vst.msk [vmem:[#allocation7 + $0x18] sm:$0xff] %vm84_vm1, %v1301_v15  ;;  %v1296_v19 = vadd.f32 %v1365_v9, %v1295_v17 }
0x16f6   :  { %v1568_v20 = vpop.f32.mrf.mxu1 }
0x16f7   :  { %1316 = vst.msk [vmem:[#allocation7 + $0x10] sm:$0xff] %vm84_vm1, %v1296_v19  ;;  %v1311_v21 = vadd.f32 %v1568_v20, %v1365_v9 }
0x16f8   :  { %v1305_v22 = vpop.f32.mrf.mxu1 }
0x16f9   :  { %1319 = vst.msk [vmem:[#allocation7 + $0x28] sm:$0xff] %vm84_vm1, %v1311_v21  ;;  %v1306_v23 = vadd.f32 %v1365_v9, %v1305_v22 }
0x16fb   :  { %1318 = vst.msk [vmem:[#allocation7 + $0x20] sm:$0xff] %vm84_vm1, %v1306_v23 }
0x16fc   :  { %1689 = shalt.err (!%p1686_p0)
}
0x16fd   :  { %1331 = dma.vmem_to_hbm [thread:$0]  %s1326_s29, 768, %s2048_s10, [#allocation4], %s1705_s16, %s1705_s16, %s1706_s17  }
0x16fe   :  { %1702 = dma.done.wait [#allocation4], 768  }
0x16ff   :  { %1703 = vsyncadd [#allocation4], 4294966528 }
0x1700   :  { %1335 = vsyncpa [#allocation3], 1 }
0x1701   :  { %1336 = vsyncpa [#allocation6], 1 }
0x1702   :  { %1337 = vsyncpa [#allocation4], 1 }

</bundles_post_ra>
